<compile_context>
chip_gen: v7x
topology: tpu7x:2x2x1
jax: 0.10.0
libtpu: 0.0.40
codegen_flags: <defaults>
</compile_context>

<pallas_src>
import functools

import jax
import jax.numpy as jnp
from jax.experimental import pallas as pl
from jax.experimental.pallas import tpu as pltpu


def _swish(v):
    # activation(x) = x * sigmoid(x); sigmoid's exp/recip run on the EUP slot.
    return v * jax.nn.sigmoid(v)


def _net_kernel(x_ref,        # (tile_b, d_in) f32   batch-major input block
                w_in_ref,     # (2W, d_in)     f32   [W_in ; W1 @ W_in]
                b_in_ref,     # (2W, 1)        f32   [b_in ; W1 @ b_in + b1]
                w_hid_ref,    # (5, W, W)      f32   [layer2..layer6]
                b_hid_ref,    # (5, W, 1)      f32
                w_out_ref,    # (1, W)         f32
                b_out_ref,    # (1, 1)         f32
                out_ref,      # (1, tile_b)    f32   lane-dense output row
                *, use_bf16):
    w = w_hid_ref.shape[1]
    op_dtype = jnp.bfloat16 if use_bf16 else jnp.float32

    # --- folded layer_in + layer1, fed batch-major -------------------------
    # z = [W_in ; W1@W_in] @ x^T + [b_in ; W1@b_in + b1]  -> (2W, tile_b).
    # NT dimension numbers (contract the two d_in axes) mirror flash-attention
    # q @ k^T, so no wrapper transpose of x is required and the result is
    # already feature-major.  Kept f32 even under use_bf16 (tiny MXU fraction).
    z = jax.lax.dot_general(
        w_in_ref[...], x_ref[...],
        dimension_numbers=(((1,), (1,)), ((), ())),
        preferred_element_type=jnp.float32) + b_in_ref[...]

    y = z[:w]            # layer_in(x)
    h = _swish(z[w:])    # act(layer1(layer_in(x)))  (layer1 folded above)

    def linear(idx, v):
        # (W, W) weight @ (W, tile_b) activation, f32 accumulate.
        return (jnp.dot(w_hid_ref[idx].astype(op_dtype), v.astype(op_dtype),
                        preferred_element_type=jnp.float32) + b_hid_ref[idx])

    # residual block 0 tail: y = y + act(layer2(h))
    y = y + _swish(linear(0, h))
    # residual blocks 1, 2: y = y + act(layer_{2k+2}(act(layer_{2k+1}(y))))
    for blk in (1, 2):
        h = _swish(linear(2 * blk - 1, y))   # layer3 / layer5
        y = y + _swish(linear(2 * blk, h))   # layer4 / layer6

    # output = layer_out(y) -> (1, tile_b): unmasked full-lane store.
    out_ref[...] = (jnp.dot(w_out_ref[...].astype(op_dtype), y.astype(op_dtype),
                            preferred_element_type=jnp.float32)
                    + b_out_ref[...]).astype(out_ref.dtype)


def net_forward(x, params, *, tile_b=2048, use_bf16=False):
    """x: [N, input_width] float32 (batch-major). Returns [N, 1] float32."""
    n, d_in = x.shape
    two_w = params["w_in_stack"].shape[0]
    w = two_w // 2

    # Lane-align the batch tile, clamp to the lane-padded batch, and guarantee
    # >= 2 grid steps whenever the batch allows it (v7x has 2 TCs per chip).
    tile_b = max(128, (int(tile_b) // 128) * 128)
    n_lane = pl.cdiv(n, 128) * 128
    tile_b = min(tile_b, n_lane)
    if n_lane >= 256:
        tile_b = min(tile_b, max(128, (n_lane // 2 // 128) * 128))
    n_pad = pl.cdiv(n, tile_b) * tile_b

    # Zero-pad extra batch rows only when needed (keeps pad lanes finite; their
    # outputs are sliced off below).  No transpose pass over x.
    x_p = x if n_pad == n else jnp.pad(x, ((0, n_pad - n), (0, 0)))

    flat = [params["w_in_stack"], params["b_in_stack"],
            params["w_hidden"], params["b_hidden"],
            params["w_out"], params["b_out"]]

    def resident(a):
        idx = (0,) * a.ndim
        return pl.BlockSpec(a.shape, lambda i, idx=idx: idx)  # constant block -> resident

    in_specs = [pl.BlockSpec((tile_b, d_in), lambda i: (i, 0))]
    in_specs += [resident(a) for a in flat]
    out_spec = pl.BlockSpec((1, tile_b), lambda i: (0, i))

    matmul_flops = 2 * n_pad * (2 * w * d_in + 5 * w * w + w)
    vpu_flops = n_pad * (6 * 2 * w + 3 * w)           # swish muls + residual adds (approx)
    bytes_accessed = n_pad * (d_in + 1) * 4 + sum(int(a.size) for a in flat) * 4

    fn = pl.pallas_call(
        functools.partial(_net_kernel, use_bf16=use_bf16),
        out_shape=jax.ShapeDtypeStruct((1, n_pad), jnp.float32),
        grid_spec=pltpu.PrefetchScalarGridSpec(
            num_scalar_prefetch=0,
            grid=(n_pad // tile_b,),
            in_specs=in_specs,
            out_specs=out_spec,
        ),
        compiler_params=pltpu.CompilerParams(
            dimension_semantics=("parallel",),          # megacore-shards batch tiles
            vmem_limit_bytes=32 * 1024 * 1024),
        cost_estimate=pl.CostEstimate(
            flops=int(matmul_flops + vpu_flops),
            transcendentals=int(6 * n_pad * w),
            bytes_accessed=int(bytes_accessed)),
    )
    out_row = fn(x_p, *flat)                 # (1, n_pad), lane-dense
    return out_row[0, :n].reshape(n, 1)


def init_params(key, input_width, layer_width):
    """PyTorch-style init U(-1/sqrt(fan_in), 1/sqrt(fan_in)); weights stored
    (out_features, in_features), biases (out_features, 1).  Returns the raw
    (unfused) parameters of the 8 Linear layers."""
    def linear_init(k, fan_in, fan_out):
        kw, kb = jax.random.split(k)
        bound = 1.0 / jnp.sqrt(jnp.float32(fan_in))
        wmat = jax.random.uniform(kw, (fan_out, fan_in), jnp.float32, -bound, bound)
        bvec = jax.random.uniform(kb, (fan_out, 1), jnp.float32, -bound, bound)
        return wmat, bvec

    keys = jax.random.split(key, 8)
    w_in, b_in = linear_init(keys[0], input_width, layer_width)
    w_layers, b_layers = [], []
    for i in range(1, 7):
        wi, bi = linear_init(keys[i], layer_width, layer_width)
        w_layers.append(wi)
        b_layers.append(bi)
    w_out, b_out = linear_init(keys[7], layer_width, 1)
    return dict(w_in=w_in, b_in=b_in, w_layers=w_layers, b_layers=b_layers,
                w_out=w_out, b_out=b_out)


def pack_params(raw):
    """Host-side packing for the kernel: fold layer1 into layer_in (exact up to
    f32 re-association, computed at HIGHEST precision) and stack layers 2..6."""
    hp = jax.lax.Precision.HIGHEST
    w_in, b_in = raw["w_in"], raw["b_in"]
    w1, b1 = raw["w_layers"][0], raw["b_layers"][0]
    w_in_stack = jnp.concatenate(
        [w_in, jnp.dot(w1, w_in, precision=hp)], axis=0)              # (2W, d_in)
    b_in_stack = jnp.concatenate(
        [b_in, jnp.dot(w1, b_in, precision=hp) + b1], axis=0)         # (2W, 1)
    return dict(
        w_in_stack=w_in_stack, b_in_stack=b_in_stack,
        w_hidden=jnp.stack(raw["w_layers"][1:]),    # (5, W, W)  layer2..layer6
        b_hidden=jnp.stack(raw["b_layers"][1:]),    # (5, W, 1)
        w_out=raw["w_out"], b_out=raw["b_out"])


def net_forward_ref(x, raw):
    """Plain-JAX reference of the PyTorch forward (unfused), for sanity checks."""
    hp = jax.lax.Precision.HIGHEST

    def lin(v, wmat, bvec):
        return jnp.dot(v, wmat.T, precision=hp) + bvec[:, 0]

    sw = lambda v: v * jax.nn.sigmoid(v)
    y = lin(x, raw["w_in"], raw["b_in"])
    for blk in range(3):
        h = sw(lin(y, raw["w_layers"][2 * blk], raw["b_layers"][2 * blk]))
        y = y + sw(lin(h, raw["w_layers"][2 * blk + 1], raw["b_layers"][2 * blk + 1]))
    return lin(y, raw["w_out"], raw["b_out"])


if __name__ == "__main__":
    input_width = 10    # 10-D problem (Train_DGM_10D)
    layer_width = 32
    batch = 300         # not lane/tile aligned -> exercises the padding path

    key = jax.random.PRNGKey(0)
    k_params, k_x, k_x2 = jax.random.split(key, 3)
    raw = init_params(k_params, input_width, layer_width)
    params = pack_params(raw)

    x = jax.random.normal(k_x, (batch, input_width), jnp.float32)
    out = jax.block_until_ready(net_forward(x, params))     # 3 x 128-lane grid steps
    ref = net_forward_ref(x, raw)
    assert out.shape == (batch, 1), out.shape
    assert jnp.allclose(out, ref, atol=1e-4, rtol=1e-4)

    # Tile-aligned batch: default tile_b with the >=2-step (megacore) clamp -> grid of 2.
    x2 = jax.random.normal(k_x2, (1024, input_width), jnp.float32)
    out2 = jax.block_until_ready(net_forward(x2, params))
    ref2 = net_forward_ref(x2, raw)
    assert out2.shape == (1024, 1), out2.shape
    assert jnp.allclose(out2, ref2, atol=1e-4, rtol=1e-4)

    # Optional bf16-operand path (f32 accumulate): intentionally loose tolerance.
    out_bf16 = jax.block_until_ready(net_forward(x2, params, use_bf16=True))
    assert bool(jnp.all(jnp.isfinite(out_bf16)))
    assert float(jnp.max(jnp.abs(out_bf16 - ref2))) < 0.1

    print("KERNEL_OK")
</pallas_src>

<mosaic_0001>
module attributes {stable_mosaic.version = 11 : i64} {
  func.func @_net_kernel(%arg0: i32, %arg1: memref<128x10xf32, #tpu.memory_space<vmem>>, %arg2: memref<64x10xf32, #tpu.memory_space<vmem>>, %arg3: memref<64x1xf32, #tpu.memory_space<vmem>>, %arg4: memref<5x32x32xf32, #tpu.memory_space<vmem>>, %arg5: memref<5x32x1xf32, #tpu.memory_space<vmem>>, %arg6: memref<1x32xf32, #tpu.memory_space<vmem>>, %arg7: memref<1x1xf32, #tpu.memory_space<vmem>>, %arg8: memref<1x128xf32, #tpu.memory_space<vmem>>) attributes {dimension_semantics = [#tpu.dimension_semantics<parallel>], iteration_bounds = array<i64: 3>, scalar_prefetch = 0 : i64, scratch_operands = 0 : i64, tpu.core_type = #tpu.core_type<tc>, window_params = [{transform_indices = @transform_0, window_bounds = array<i64: 128, 10>}, {pipeline_mode = #tpu.pipeline_mode<synchronous>, transform_indices = @transform_1, window_bounds = array<i64: 64, 10>}, {pipeline_mode = #tpu.pipeline_mode<synchronous>, transform_indices = @transform_2, window_bounds = array<i64: 64, 1>}, {pipeline_mode = #tpu.pipeline_mode<synchronous>, transform_indices = @transform_3, window_bounds = array<i64: 5, 32, 32>}, {pipeline_mode = #tpu.pipeline_mode<synchronous>, transform_indices = @transform_4, window_bounds = array<i64: 5, 32, 1>}, {pipeline_mode = #tpu.pipeline_mode<synchronous>, transform_indices = @transform_5, window_bounds = array<i64: 1, 32>}, {pipeline_mode = #tpu.pipeline_mode<synchronous>, transform_indices = @transform_6, window_bounds = array<i64: 1, 1>}, {transform_indices = @transform_7, window_bounds = array<i64: 1, 128>}]} {
    %c0 = arith.constant 0 : index
    %c0_0 = arith.constant 0 : index
    %0 = vector.load %arg2[%c0, %c0_0] : memref<64x10xf32, #tpu.memory_space<vmem>>, vector<64x10xf32>
    %c0_1 = arith.constant 0 : index
    %c0_2 = arith.constant 0 : index
    %1 = vector.load %arg1[%c0_1, %c0_2] : memref<128x10xf32, #tpu.memory_space<vmem>>, vector<128x10xf32>
    %cst = arith.constant dense<0.000000e+00> : vector<64x128xf32>
    %2 = tpu.matmul %0, %1, %cst {dimension_numbers = #tpu.dot_dimension_numbers<[1], [1], [0], [0], [0, 0, 1, 0], [], []>} : vector<64x10xf32>, vector<128x10xf32>, vector<64x128xf32> -> vector<64x128xf32>
    %c0_3 = arith.constant 0 : index
    %c0_4 = arith.constant 0 : index
    %3 = vector.load %arg3[%c0_3, %c0_4] : memref<64x1xf32, #tpu.memory_space<vmem>>, vector<64x1xf32>
    %4 = vector.broadcast %3 : vector<64x1xf32> to vector<64x128xf32>
    %5 = arith.addf %2, %4 : vector<64x128xf32>
    %6 = vector.extract_strided_slice %5 {offsets = [0, 0], sizes = [32, 128], strides = [1, 1]} : vector<64x128xf32> to vector<32x128xf32>
    %7 = vector.extract_strided_slice %5 {offsets = [32, 0], sizes = [32, 128], strides = [1, 1]} : vector<64x128xf32> to vector<32x128xf32>
    %8 = arith.negf %7 : vector<32x128xf32>
    %9 = math.exp %8 : vector<32x128xf32>
    %cst_5 = arith.constant 1.000000e+00 : f32
    %10 = vector.broadcast %cst_5 : f32 to vector<32x128xf32>
    %11 = arith.addf %10, %9 : vector<32x128xf32>
    %12 = arith.divf %10, %11 : vector<32x128xf32>
    %13 = arith.mulf %7, %12 : vector<32x128xf32>
    %c0_6 = arith.constant 0 : index
    %c0_7 = arith.constant 0 : index
    %c0_8 = arith.constant 0 : index
    %14 = vector.load %arg4[%c0_6, %c0_7, %c0_8] : memref<5x32x32xf32, #tpu.memory_space<vmem>>, vector<1x32x32xf32>
    %15 = vector.shape_cast %14 : vector<1x32x32xf32> to vector<32x32xf32>
    %cst_9 = arith.constant dense<0.000000e+00> : vector<32x128xf32>
    %16 = tpu.matmul %15, %13, %cst_9 {dimension_numbers = #tpu.dot_dimension_numbers<[1], [0], [0], [1], [0, 0, 1, 1], [], []>} : vector<32x32xf32>, vector<32x128xf32>, vector<32x128xf32> -> vector<32x128xf32>
    %c0_10 = arith.constant 0 : index
    %c0_11 = arith.constant 0 : index
    %c0_12 = arith.constant 0 : index
    %17 = vector.load %arg5[%c0_10, %c0_11, %c0_12] : memref<5x32x1xf32, #tpu.memory_space<vmem>>, vector<1x32x1xf32>
    %18 = vector.shape_cast %17 : vector<1x32x1xf32> to vector<32x1xf32>
    %19 = vector.broadcast %18 : vector<32x1xf32> to vector<32x128xf32>
    %20 = arith.addf %16, %19 : vector<32x128xf32>
    %21 = arith.negf %20 : vector<32x128xf32>
    %22 = math.exp %21 : vector<32x128xf32>
    %cst_13 = arith.constant 1.000000e+00 : f32
    %23 = vector.broadcast %cst_13 : f32 to vector<32x128xf32>
    %24 = arith.addf %23, %22 : vector<32x128xf32>
    %25 = arith.divf %23, %24 : vector<32x128xf32>
    %26 = arith.mulf %20, %25 : vector<32x128xf32>
    %27 = arith.addf %6, %26 : vector<32x128xf32>
    %c1 = arith.constant 1 : index
    %c0_14 = arith.constant 0 : index
    %c0_15 = arith.constant 0 : index
    %28 = vector.load %arg4[%c1, %c0_14, %c0_15] : memref<5x32x32xf32, #tpu.memory_space<vmem>>, vector<1x32x32xf32>
    %29 = vector.shape_cast %28 : vector<1x32x32xf32> to vector<32x32xf32>
    %cst_16 = arith.constant dense<0.000000e+00> : vector<32x128xf32>
    %30 = tpu.matmul %29, %27, %cst_16 {dimension_numbers = #tpu.dot_dimension_numbers<[1], [0], [0], [1], [0, 0, 1, 1], [], []>} : vector<32x32xf32>, vector<32x128xf32>, vector<32x128xf32> -> vector<32x128xf32>
    %c1_17 = arith.constant 1 : index
    %c0_18 = arith.constant 0 : index
    %c0_19 = arith.constant 0 : index
    %31 = vector.load %arg5[%c1_17, %c0_18, %c0_19] : memref<5x32x1xf32, #tpu.memory_space<vmem>>, vector<1x32x1xf32>
    %32 = vector.shape_cast %31 : vector<1x32x1xf32> to vector<32x1xf32>
    %33 = vector.broadcast %32 : vector<32x1xf32> to vector<32x128xf32>
    %34 = arith.addf %30, %33 : vector<32x128xf32>
    %35 = arith.negf %34 : vector<32x128xf32>
    %36 = math.exp %35 : vector<32x128xf32>
    %cst_20 = arith.constant 1.000000e+00 : f32
    %37 = vector.broadcast %cst_20 : f32 to vector<32x128xf32>
    %38 = arith.addf %37, %36 : vector<32x128xf32>
    %39 = arith.divf %37, %38 : vector<32x128xf32>
    %40 = arith.mulf %34, %39 : vector<32x128xf32>
    %c2 = arith.constant 2 : index
    %c0_21 = arith.constant 0 : index
    %c0_22 = arith.constant 0 : index
    %41 = vector.load %arg4[%c2, %c0_21, %c0_22] : memref<5x32x32xf32, #tpu.memory_space<vmem>>, vector<1x32x32xf32>
    %42 = vector.shape_cast %41 : vector<1x32x32xf32> to vector<32x32xf32>
    %cst_23 = arith.constant dense<0.000000e+00> : vector<32x128xf32>
    %43 = tpu.matmul %42, %40, %cst_23 {dimension_numbers = #tpu.dot_dimension_numbers<[1], [0], [0], [1], [0, 0, 1, 1], [], []>} : vector<32x32xf32>, vector<32x128xf32>, vector<32x128xf32> -> vector<32x128xf32>
    %c2_24 = arith.constant 2 : index
    %c0_25 = arith.constant 0 : index
    %c0_26 = arith.constant 0 : index
    %44 = vector.load %arg5[%c2_24, %c0_25, %c0_26] : memref<5x32x1xf32, #tpu.memory_space<vmem>>, vector<1x32x1xf32>
    %45 = vector.shape_cast %44 : vector<1x32x1xf32> to vector<32x1xf32>
    %46 = vector.broadcast %45 : vector<32x1xf32> to vector<32x128xf32>
    %47 = arith.addf %43, %46 : vector<32x128xf32>
    %48 = arith.negf %47 : vector<32x128xf32>
    %49 = math.exp %48 : vector<32x128xf32>
    %cst_27 = arith.constant 1.000000e+00 : f32
    %50 = vector.broadcast %cst_27 : f32 to vector<32x128xf32>
    %51 = arith.addf %50, %49 : vector<32x128xf32>
    %52 = arith.divf %50, %51 : vector<32x128xf32>
    %53 = arith.mulf %47, %52 : vector<32x128xf32>
    %54 = arith.addf %27, %53 : vector<32x128xf32>
    %c3 = arith.constant 3 : index
    %c0_28 = arith.constant 0 : index
    %c0_29 = arith.constant 0 : index
    %55 = vector.load %arg4[%c3, %c0_28, %c0_29] : memref<5x32x32xf32, #tpu.memory_space<vmem>>, vector<1x32x32xf32>
    %56 = vector.shape_cast %55 : vector<1x32x32xf32> to vector<32x32xf32>
    %cst_30 = arith.constant dense<0.000000e+00> : vector<32x128xf32>
    %57 = tpu.matmul %56, %54, %cst_30 {dimension_numbers = #tpu.dot_dimension_numbers<[1], [0], [0], [1], [0, 0, 1, 1], [], []>} : vector<32x32xf32>, vector<32x128xf32>, vector<32x128xf32> -> vector<32x128xf32>
    %c3_31 = arith.constant 3 : index
    %c0_32 = arith.constant 0 : index
    %c0_33 = arith.constant 0 : index
    %58 = vector.load %arg5[%c3_31, %c0_32, %c0_33] : memref<5x32x1xf32, #tpu.memory_space<vmem>>, vector<1x32x1xf32>
    %59 = vector.shape_cast %58 : vector<1x32x1xf32> to vector<32x1xf32>
    %60 = vector.broadcast %59 : vector<32x1xf32> to vector<32x128xf32>
    %61 = arith.addf %57, %60 : vector<32x128xf32>
    %62 = arith.negf %61 : vector<32x128xf32>
    %63 = math.exp %62 : vector<32x128xf32>
    %cst_34 = arith.constant 1.000000e+00 : f32
    %64 = vector.broadcast %cst_34 : f32 to vector<32x128xf32>
    %65 = arith.addf %64, %63 : vector<32x128xf32>
    %66 = arith.divf %64, %65 : vector<32x128xf32>
    %67 = arith.mulf %61, %66 : vector<32x128xf32>
    %c4 = arith.constant 4 : index
    %c0_35 = arith.constant 0 : index
    %c0_36 = arith.constant 0 : index
    %68 = vector.load %arg4[%c4, %c0_35, %c0_36] : memref<5x32x32xf32, #tpu.memory_space<vmem>>, vector<1x32x32xf32>
    %69 = vector.shape_cast %68 : vector<1x32x32xf32> to vector<32x32xf32>
    %cst_37 = arith.constant dense<0.000000e+00> : vector<32x128xf32>
    %70 = tpu.matmul %69, %67, %cst_37 {dimension_numbers = #tpu.dot_dimension_numbers<[1], [0], [0], [1], [0, 0, 1, 1], [], []>} : vector<32x32xf32>, vector<32x128xf32>, vector<32x128xf32> -> vector<32x128xf32>
    %c4_38 = arith.constant 4 : index
    %c0_39 = arith.constant 0 : index
    %c0_40 = arith.constant 0 : index
    %71 = vector.load %arg5[%c4_38, %c0_39, %c0_40] : memref<5x32x1xf32, #tpu.memory_space<vmem>>, vector<1x32x1xf32>
    %72 = vector.shape_cast %71 : vector<1x32x1xf32> to vector<32x1xf32>
    %73 = vector.broadcast %72 : vector<32x1xf32> to vector<32x128xf32>
    %74 = arith.addf %70, %73 : vector<32x128xf32>
    %75 = arith.negf %74 : vector<32x128xf32>
    %76 = math.exp %75 : vector<32x128xf32>
    %cst_41 = arith.constant 1.000000e+00 : f32
    %77 = vector.broadcast %cst_41 : f32 to vector<32x128xf32>
    %78 = arith.addf %77, %76 : vector<32x128xf32>
    %79 = arith.divf %77, %78 : vector<32x128xf32>
    %80 = arith.mulf %74, %79 : vector<32x128xf32>
    %81 = arith.addf %54, %80 : vector<32x128xf32>
    %c0_42 = arith.constant 0 : index
    %c0_43 = arith.constant 0 : index
    %82 = vector.load %arg6[%c0_42, %c0_43] : memref<1x32xf32, #tpu.memory_space<vmem>>, vector<1x32xf32>
    %cst_44 = arith.constant dense<0.000000e+00> : vector<1x128xf32>
    %83 = tpu.matmul %82, %81, %cst_44 {dimension_numbers = #tpu.dot_dimension_numbers<[1], [0], [0], [1], [0, 0, 1, 1], [], []>} : vector<1x32xf32>, vector<32x128xf32>, vector<1x128xf32> -> vector<1x128xf32>
    %c0_45 = arith.constant 0 : index
    %c0_46 = arith.constant 0 : index
    %84 = vector.load %arg7[%c0_45, %c0_46] : memref<1x1xf32, #tpu.memory_space<vmem>>, vector<1x1xf32>
    %85 = vector.broadcast %84 : vector<1x1xf32> to vector<1x128xf32>
    %86 = arith.addf %83, %85 : vector<1x128xf32>
    %c0_47 = arith.constant 0 : index
    %c0_48 = arith.constant 0 : index
    %87 = vector.load %arg8[%c0_47, %c0_48] : memref<1x128xf32, #tpu.memory_space<vmem>>, vector<1x128xf32>
    tpu.vector_store %arg8[%c0_47, %c0_48], %86 {strides = array<i32>} : memref<1x128xf32, #tpu.memory_space<vmem>>, vector<1x128xf32>,
    return
  }
  func.func @transform_0(%arg0: i32) -> (i32, i32) {
    %c0_i32 = arith.constant 0 : i32
    %c0_i32_0 = arith.constant 0 : i32
    return %arg0, %c0_i32 : i32, i32
  }
  func.func @transform_1(%arg0: i32) -> (i32, i32) {
    %c0_i32 = arith.constant 0 : i32
    %c0_i32_0 = arith.constant 0 : i32
    %c0_i32_1 = arith.constant 0 : i32
    return %c0_i32, %c0_i32_0 : i32, i32
  }
  func.func @transform_2(%arg0: i32) -> (i32, i32) {
    %c0_i32 = arith.constant 0 : i32
    %c0_i32_0 = arith.constant 0 : i32
    %c0_i32_1 = arith.constant 0 : i32
    return %c0_i32, %c0_i32_0 : i32, i32
  }
  func.func @transform_3(%arg0: i32) -> (i32, i32, i32) {
    %c0_i32 = arith.constant 0 : i32
    %c0_i32_0 = arith.constant 0 : i32
    %c0_i32_1 = arith.constant 0 : i32
    %c0_i32_2 = arith.constant 0 : i32
    return %c0_i32, %c0_i32_0, %c0_i32_1 : i32, i32, i32
  }
  func.func @transform_4(%arg0: i32) -> (i32, i32, i32) {
    %c0_i32 = arith.constant 0 : i32
    %c0_i32_0 = arith.constant 0 : i32
    %c0_i32_1 = arith.constant 0 : i32
    %c0_i32_2 = arith.constant 0 : i32
    return %c0_i32, %c0_i32_0, %c0_i32_1 : i32, i32, i32
  }
  func.func @transform_5(%arg0: i32) -> (i32, i32) {
    %c0_i32 = arith.constant 0 : i32
    %c0_i32_0 = arith.constant 0 : i32
    %c0_i32_1 = arith.constant 0 : i32
    return %c0_i32, %c0_i32_0 : i32, i32
  }
  func.func @transform_6(%arg0: i32) -> (i32, i32) {
    %c0_i32 = arith.constant 0 : i32
    %c0_i32_0 = arith.constant 0 : i32
    %c0_i32_1 = arith.constant 0 : i32
    return %c0_i32, %c0_i32_0 : i32, i32
  }
  func.func @transform_7(%arg0: i32) -> (i32, i32) {
    %c0_i32 = arith.constant 0 : i32
    %c0_i32_0 = arith.constant 0 : i32
    return %c0_i32, %arg0 : i32, i32
  }
}

</mosaic_0001>

<bundles_post_ra>
// kernel: tpu_custom_call.1
= control target key start
LH: loop header
LB: loop body
LE: loop exit
PB: predicated region body
PF: predicated region fallthrough
CT: control target
= control target key end

     0   :  { %s2547_s0 = inlined_call_operand.vmem [shape: f32[384,10], index: 0, kind: input, shape index: {}]   ;;  %s2548_s1 = inlined_call_operand.vmem [shape: f32[64,10], index: 1, kind: input, shape index: {}]   ;;  %s2549_s2 = inlined_call_operand.vmem [shape: f32[64,1], index: 2, kind: input, shape index: {}]   ;;  %s2550_s3 = inlined_call_operand.vmem [shape: f32[5,32,32], index: 3, kind: input, shape index: {}]   ;;  %s2551_s4 = inlined_call_operand.vmem [shape: f32[5,32,1], index: 4, kind: input, shape index: {}]   ;;  %s2552_s5 = inlined_call_operand.vmem [shape: f32[1,32], index: 5, kind: input, shape index: {}]   ;;  %s2553_s6 = inlined_call_operand.<no memory space> [shape: f32[1,1], index: 6, kind: input, shape index: {}]   ;;  %s2554_s7 = inlined_call_operand.hbm [shape: f32[1,384], index: 7, kind: output, shape index: {}]  }
   0x1   :  { %v12_v0 = vstv %s2553_s6 }
   0x2   :  { %13 = vst [vmem:[#allocation2] sm:$0x1] %v12_v0 }
   0x3   :  { %14 = vsyncpa [#allocation4], 0 }
   0x4   :  { %16 = vsyncpa [#allocation4 + $0x1], 0  ;;  %s2148_s26 = smov 0   ;;  %s2150_s27 = smov 0  }
   0x5   :  { %s2152_s28 = smov 0   ;;  %s2154_s29 = smov 0  }
   0x6 LB: > { %s1496_s6 = sadd.s32 4294967295, %s2098_s29   ;;  %s1497_s30 = sadd.s32 4294967294, %s2098_s29   ;;  %s2098_s29 = sphi %s2154_s29, %s2562_s29   ;;  %s2094_s28 = sphi %s2152_s28, %s2561_s28   ;;  %s2090_s27 = sphi %s2150_s27, %s2560_s27   ;;  %s2086_s26 = sphi %s2148_s26, %s2559_s26  }
   0x7   : > { %s2171_s8 = sadd.s32 1, %s2098_s29   ;;  %s181_s9 = sadd.s32 1, %s2094_s28 }
   0x8   : > { %s178_s10 = ssub.s32 %s2098_s29, %s2171_s8  ;;  %p191_p0 = scmp.ne.s32.totalorder %s2094_s28, %s2090_s27 }
   0x9   : > { %p179_p1 = scmp.eq.s32.totalorder %s178_s10, 0  ;;  %p192_p2 = scmp.eq.s32.totalorder %s1496_s6, 2 }
   0xa   : > { %p197_p3 = scmp.ne.s32.totalorder %s2090_s27, %s2086_s26  ;;  %p198_p4 = scmp.eq.s32.totalorder %s1497_s30, 2 }
   0xb   : > { %s2181_s11 = scalar_select %p179_p1, %s2094_s28, %s181_s9  }
   0xc   : > { %p2183_p5 = por %p192_p2, %p191_p0  ;;  %p2187_p6 = por %p198_p4, %p197_p3 }
   0xd   : > { %p1500_p7 = scmp.ge.s32.totalorder %s2098_s29, 1  ;;  %p243_p8 = scmp.lt.s32.totalorder %s2098_s29, 4 }
   0xf   : > { %p244_p9 = pnand %p1500_p7, %p243_p8 }
  0x10   : > { %s2193_s14 = sshll.u32 (!%p244_p9), %s1496_s6, 4  ;;  %vm352_vm0 = vcmask (!%p244_p9), 80896   ;;  %v280_v1 = vld [vmem:[%s2548_s1] sm:$0xff] (!%p244_p9)  ;;  %v2100_v2 = vmov (!%p244_p9), 0   ;;  %v310_v4 = vld [vmem:[%s2549_s2 + $0x30] sm:$0xff] (!%p244_p9)  ;;  %v309_v5 = vld [vmem:[%s2549_s2 + $0x28] sm:$0xff] (!%p244_p9) }
  0x11   : > { %247 = sbr.rel (%p244_p9) target bundleno = 1854 (0x73e), region = 48  ;;  %p275_p10 = scmp.lt.s32.totalorder (!%p244_p9), %s2193_s14, 47  ;;  %1708 = vmatprep.mubr.msk.f32.mxu0 (!%p244_p9), %vm352_vm0, %v280_v1  ;;  %1938 = vset.pattern.permute.xlu0 (!%p244_p9), %v2100_v2  ;;  %v308_v3 = vld [vmem:[%s2549_s2 + $0x20] sm:$0xff] (!%p244_p9)  ;;  %v311_v6 = vld [vmem:[%s2549_s2 + $0x38] sm:$0xff] (!%p244_p9)  ;;  %vm2220_vm1 = vmpackc.low (!%p244_p9), %vm352_vm0, %vm352_vm0  ;;  %vm586_vm2 = vcmask (!%p244_p9), 261120   ;;  %vm2102_vm3 = vmmov (!%p244_p9), 0  }
  0x12   : > { %1939 = vset.pattern.permute.xlu1 (!%p244_p9), %v2100_v2  ;;  %334 = vperm.xlu0 (!%p244_p9), %1938, %v308_v3   ;;  %v562_v14 = vld [vmem:[%s2551_s4] sm:$0xff] (!%p244_p9)  ;;  %v563_v15 = vld [vmem:[%s2551_s4 + $0x8] sm:$0xff] (!%p244_p9)  ;;  %v564_v18 = vld [vmem:[%s2551_s4 + $0x10] sm:$0xff] (!%p244_p9)  ;;  %s2505_s21 = scalar_lea.hbm (!%p244_p9), %s2554_s7, %s2193_s14  ;;  %s2104_s24 = smov (!%p244_p9), [#allocation3]  }
  0x13   : > { %344 = vperm.xlu1 (!%p244_p9), %1939, %v310_v4   ;;  %v565_v19 = vld [vmem:[%s2551_s4 + $0x18] sm:$0xff] (!%p244_p9)  ;;  %v304_v21 = vld [vmem:[%s2549_s2] sm:$0xff] (!%p244_p9)  ;;  %v305_v22 = vld [vmem:[%s2549_s2 + $0x8] sm:$0xff] (!%p244_p9)  ;;  %s2040_s25 = sshll.u32 (!%p244_p9), %s2104_s24, 4  ;;  %s2041_s25 = int_to_ptr.vmem [resolvable:$false] %s2040_s25 }
  0x14   : > { %v306_v25 = vld [vmem:[%s2549_s2 + $0x10] sm:$0xff] (!%p244_p9)  ;;  %v307_v26 = vld [vmem:[%s2549_s2 + $0x18] sm:$0xff] (!%p244_p9)  ;;  %v1543_v28 = vld [vmem:[%s2551_s4 + $0x20] sm:$0xff] (!%p244_p9)  ;;  %s2042_s6 = scalar_lea.vmem (!%p244_p9), %s2041_s25, 32 }
  0x15   : > { %v1544_v29 = vld [vmem:[%s2551_s4 + $0x28] sm:$0xff] (!%p244_p9)  ;;  %v1545_v32 = vld [vmem:[%s2551_s4 + $0x30] sm:$0xff] (!%p244_p9)  ;;  %v1546_v33 = vld [vmem:[%s2551_s4 + $0x38] sm:$0xff] (!%p244_p9) }
  0x16   : > { %339 = vperm.xlu0 (!%p244_p9), %1938, %v309_v5   ;;  %v1559_v35 = vld [vmem:[%s2551_s4 + $0x40] sm:$0xff] (!%p244_p9)  ;;  %v1560_v36 = vld [vmem:[%s2551_s4 + $0x48] sm:$0xff] (!%p244_p9)  ;;  %v1561_v39 = vld [vmem:[%s2551_s4 + $0x50] sm:$0xff] (!%p244_p9) }
  0x17   : > { %349 = vperm.xlu1 (!%p244_p9), %1939, %v311_v6   ;;  %v1562_v40 = vld [vmem:[%s2551_s4 + $0x58] sm:$0xff] (!%p244_p9)  ;;  %v1575_v42 = vld [vmem:[%s2551_s4 + $0x60] sm:$0xff] (!%p244_p9)  ;;  %v1576_v43 = vld [vmem:[%s2551_s4 + $0x68] sm:$0xff] (!%p244_p9) }
  0x18   : > { %s276_s17 = scalar_select %p275_p10, %s2193_s14, 47  ;;  %v1577_v46 = vld [vmem:[%s2551_s4 + $0x70] sm:$0xff]  ;;  %v1578_v47 = vld [vmem:[%s2551_s4 + $0x78] sm:$0xff]  ;;  %v1591_v49 = vld [vmem:[%s2551_s4 + $0x80] sm:$0xff] }
  0x19   : > { %v1592_v50 = vld [vmem:[%s2551_s4 + $0x88] sm:$0xff]  ;;  %v1593_v53 = vld [vmem:[%s2551_s4 + $0x90] sm:$0xff]  ;;  %v1594_v54 = vld [vmem:[%s2551_s4 + $0x98] sm:$0xff] }
  0x1a   : > { %s1502_s22 = sshll.u32 %s276_s17, 3  ;;  %568 = vperm.xlu0 %1938, %v562_v14   ;;  %v1345_v56 = vld [vmem:[#allocation2] sm:$0x1]  ;;  %v281_v57 = vld [vmem:[%s2548_s1 + $0x8] sm:$0xff]  ;;  %v282_v58 = vld [vmem:[%s2548_s1 + $0x10] sm:$0xff]  ;;  %s272_s17 = sand.u32 1, %s2090_s27  }
  0x1b   : > { %s2216_s10 = scalar_lea.vmem %s2547_s0, %s1502_s22  ;;  %573 = vperm.xlu1 %1939, %v563_v15   ;;  %v283_v59 = vld [vmem:[%s2548_s1 + $0x18] sm:$0xff]  ;;  %v284_v60 = vld [vmem:[%s2548_s1 + $0x20] sm:$0xff]  ;;  %v285_v61 = vld [vmem:[%s2548_s1 + $0x28] sm:$0xff]  ;;  %s273_s18 = scalar_lea.vmem [#allocation3], %s272_s17 }
  0x1c   : > { %v288_v8 = vld [vmem:[%s2216_s10] sm:$0xff]  ;;  %v289_v9 = vld [vmem:[%s2216_s10 + $0x8] sm:$0xff]  ;;  %v290_v10 = vld [vmem:[%s2216_s10 + $0x10] sm:$0xff]  ;;  %s1442_s19 = sshll.u32 %s273_s18, 4  ;;  %s1430_s22 = scalar_lea.sflag [#allocation4], %s272_s17  ;;  %s2507_s19 = int_to_ptr.vmem [resolvable:$true] %s1442_s19 }
  0x1d   : > { %v1801_v11 = vpack.c.bf16 %v289_v9, %v288_v8  ;;  %v291_v12 = vld [vmem:[%s2216_s10 + $0x18] sm:$0xff]  ;;  %v292_v16 = vld [vmem:[%s2216_s10 + $0x20] sm:$0xff]  ;;  %v293_v17 = vld [vmem:[%s2216_s10 + $0x28] sm:$0xff]  ;;  %s2036_s23 = scalar_lea.vmem %s2507_s19, 16  ;;  %p2043_p0 = scmp.lt.s32.totalorder %s2507_s19, %s2041_s25 }
  0x1e   : > { %v1807_v13 = vpack.c.bf16 %v291_v12, %v290_v10  ;;  %v1813_v20 = vpack.c.bf16 %v293_v17, %v292_v16  ;;  %578 = vperm.xlu0 %1938, %v564_v18   ;;  %v294_v23 = vld [vmem:[%s2216_s10 + $0x30] sm:$0xff]  ;;  %v295_v24 = vld [vmem:[%s2216_s10 + $0x38] sm:$0xff]  ;;  %v296_v30 = vld [vmem:[%s2216_s10 + $0x40] sm:$0xff]  ;;  %p2037_p11 = scmp.ne.s32.totalorder %s2507_s19, %s2036_s23  ;;  %p2044_p1 = scmp.lt.s32.totalorder %s2042_s6, %s2036_s23 }
  0x1f   : > { %1803 = vmatprep.subr.msk.bf16.mxu0 %vm2220_vm1, %v1801_v11  ;;  %583 = vperm.xlu1 %1939, %v565_v19   ;;  %v1819_v27 = vpack.c.bf16 %v295_v24, %v294_v23  ;;  %v297_v31 = vld [vmem:[%s2216_s10 + $0x48] sm:$0xff]  ;;  %v298_v37 = vld [vmem:[%s2216_s10 + $0x50] sm:$0xff]  ;;  %v299_v38 = vld [vmem:[%s2216_s10 + $0x58] sm:$0xff] }
  0x20   : > { %1806 = vmatpush3.bf16.xpose.msk.msra.mxu0 %vm2220_vm1, %v1801_v11  ;;  %v1825_v34 = vpack.c.bf16 %v297_v31, %v296_v30  ;;  %v1831_v41 = vpack.c.bf16 %v299_v38, %v298_v37  ;;  %v300_v44 = vld [vmem:[%s2216_s10 + $0x60] sm:$0xff]  ;;  %v301_v45 = vld [vmem:[%s2216_s10 + $0x68] sm:$0xff]  ;;  %v302_v51 = vld [vmem:[%s2216_s10 + $0x70] sm:$0xff]  ;;  %p2038_p12 = pnand %p2037_p11, %p2183_p5  ;;  %p2045_p2 = por %p2044_p1, %p2043_p0 }
  0x21   : > { %1809 = vmatprep.subr.msk.bf16.mxu0 %vm2220_vm1, %v1807_v13  ;;  %v1837_v48 = vpack.c.bf16 %v301_v45, %v300_v44  ;;  %v303_v52 = vld [vmem:[%s2216_s10 + $0x78] sm:$0xff]  ;;  %v286_v62 = vld [vmem:[%s2548_s1 + $0x30] sm:$0xff]  ;;  %v558_v0 = vld [vmem:[%s2550_s3] sm:$0xff] }
  0x22   : > { %314 = vperm.xlu0 %1938, %v304_v21   ;;  %v1843_v55 = vpack.c.bf16 %v303_v52, %v302_v51  ;;  %v287_v63 = vld [vmem:[%s2548_s1 + $0x38] sm:$0xff]  ;;  %1728 = vmatprep.mubr.msk.f32.mxu1 %vm586_vm2, %v558_v0  ;;  %p2039_p13 = pneg %p2038_p12 }
  0x23   : > { %319 = vperm.xlu1 %1939, %v305_v22  }
  0x24   : > { %p2046_p3 = pnand %p2045_p2, %p2039_p13 }
  0x26   : > { %324 = vperm.xlu0 %1938, %v306_v25  }
  0x27   : > { %329 = vperm.xlu1 %1939, %v307_v26  }
  0x28   : > { %1812 = vmatpush3.bf16.xpose.msk.msra.mxu0 %vm2220_vm1, %v1807_v13 }
  0x29   : > { %1815 = vmatprep.subr.msk.bf16.mxu0 %vm2220_vm1, %v1813_v20 }
  0x2a   : > { %728 = vperm.xlu0 %1938, %v1543_v28  }
  0x2b   : > { %733 = vperm.xlu1 %1939, %v1544_v29  }
  0x2e   : > { %738 = vperm.xlu0 %1938, %v1545_v32  }
  0x2f   : > { %743 = vperm.xlu1 %1939, %v1546_v33  }
  0x30   : > { %1818 = vmatpush3.bf16.xpose.msk.msra.mxu0 %vm2220_vm1, %v1813_v20 }
  0x31   : > { %1821 = vmatprep.subr.msk.bf16.mxu0 %vm2220_vm1, %v1819_v27 }
  0x32   : > { %883 = vperm.xlu0 %1938, %v1559_v35  }
  0x33   : > { %888 = vperm.xlu1 %1939, %v1560_v36  }
  0x36   : > { %893 = vperm.xlu0 %1938, %v1561_v39   ;;  %v559_v39 = vld [vmem:[%s2550_s3 + $0x8] sm:$0xff] }
  0x37   : > { %898 = vperm.xlu1 %1939, %v1562_v40   ;;  %v560_v40 = vld [vmem:[%s2550_s3 + $0x10] sm:$0xff] }
  0x38   : > { %1824 = vmatpush3.bf16.xpose.msk.msra.mxu0 %vm2220_vm1, %v1819_v27 }
  0x39   : > { %1827 = vmatprep.subr.msk.bf16.mxu0 %vm2220_vm1, %v1825_v34 }
  0x3a   : > { %1042 = vperm.xlu0 %1938, %v1575_v42   ;;  %v1539_v42 = vld [vmem:[%s2550_s3 + $0x20] sm:$0xff] }
  0x3b   : > { %1047 = vperm.xlu1 %1939, %v1576_v43  }
  0x3e   : > { %1052 = vperm.xlu0 %1938, %v1577_v46  }
  0x3f   : > { %1057 = vperm.xlu1 %1939, %v1578_v47  }
  0x40   : > { %1830 = vmatpush3.bf16.xpose.msk.msra.mxu0 %vm2220_vm1, %v1825_v34 }
  0x41   : > { %1833 = vmatprep.subr.msk.bf16.mxu0 %vm2220_vm1, %v1831_v41 }
  0x42   : > { %1197 = vperm.xlu0 %1938, %v1591_v49  }
  0x43   : > { %1202 = vperm.xlu1 %1939, %v1592_v50  }
  0x46   : > { %1207 = vperm.xlu0 %1938, %v1593_v53  }
  0x47   : > { %1212 = vperm.xlu1 %1939, %v1594_v54  }
  0x48   : > { %1836 = vmatpush3.bf16.xpose.msk.msra.mxu0 %vm2220_vm1, %v1831_v41  ;;  %v561_v41 = vld [vmem:[%s2550_s3 + $0x18] sm:$0xff] }
  0x49   : > { %1839 = vmatprep.subr.msk.bf16.mxu0 %vm2220_vm1, %v1837_v48 }
  0x4a   : > { %1348 = vperm.xlu0 %1938, %v1345_v56  }
  0x50   : > { %1842 = vmatpush3.bf16.xpose.msk.msra.mxu0 %vm2220_vm1, %v1837_v48 }
  0x51   : > { %1845 = vmatprep.subr.msk.bf16.mxu0 %vm2220_vm1, %v1843_v55 }
  0x58   : > { %1848 = vmatpush3.bf16.xpose.msk.msra.mxu0 %vm2220_vm1, %v1843_v55 }
  0x5f   : > { %1709 = vmatmul.mubr.msk.f32.vlgmr.msra.gmra.mrb[0].mxu0 %vm352_vm0, %v281_v57 }
  0x60   : > { %1711 = vmatprep.mubr.msk.f32.mxu0 %vm352_vm0, %v282_v58 }
  0x63   : > { %1712 = vmatmul.mubr.msk.f32.gmra.mrb[2].mxu0 %vm352_vm0, %v283_v59 }
  0x64   : > { %1714 = vmatprep.mubr.msk.f32.mxu0 %vm352_vm0, %v284_v60 }
  0x67   : > { %1715 = vmatmul.mubr.msk.f32.gmra.mrb[4].mxu0 %vm352_vm0, %v285_v61 }
  0x68   : > { %1717 = vmatprep.mubr.msk.f32.mxu0 %vm352_vm0, %v286_v62 }
  0x6b   : > { %1718 = vmatmul.mubr.msk.f32.gmra.mrb[6].mxu0 %vm352_vm0, %v287_v63 }
  0x91   : > { %v335_v3 = vpop.permute.xlu0 %334 }
  0x92   : > { %v345_v6 = vpop.permute.xlu1 %344 }
  0x95   : > { %v340_v7 = vpop.permute.xlu0 %339 }
  0x96   : > { %v350_v13 = vpop.permute.xlu1 %349 }
  0x99   : > { %v569_v44 = vpop.permute.xlu0 %568 }
  0x9a   : > { %v574_v43 = vpop.permute.xlu1 %573 }
  0x9d   : > { %v579_v53 = vpop.permute.xlu0 %578 }
  0x9e   : > { %v584_v50 = vpop.permute.xlu1 %583 }
 0x132   : > { %v2376_v1 = vpop.f32.mrb[0].mxu0 }
 0x133   : > { %v2378_v2 = vpop.f32.mrb[1].mxu0 }
 0x136   : > { %v2380_v4 = vpop.f32.mrb[2].mxu0 }
 0x137   : > { %v2382_v5 = vpop.f32.mrb[3].mxu0 }
 0x13a   : > { %v1716_v8 = vpop.f32.mrb[4].mxu0 }
 0x13b   : > { %v517_v9 = vadd.f32 %v1716_v8, %v340_v7  ;;  %v511_v10 = vpop.f32.mrb[5].mxu0  ;;  %v320_v7 = vpop.permute.xlu1 %319 }
 0x13c   : > { %v512_v11 = vadd.f32 %v511_v10, %v335_v3  ;;  %v315_v8 = vpop.permute.xlu0 %314 }
 0x13d   : > { %v1528_v12 = vmul.f32 -1.442695, %v517_v9 }
 0x13e   : > { %v1527_v14 = vmul.f32 -1.442695, %v512_v11  ;;  %v1719_v15 = vpop.f32.mrb[6].mxu0 }
 0x13f   : > { %1940 = vpow2.f32 %v1528_v12  ;;  %v527_v16 = vadd.f32 %v1719_v15, %v350_v13  ;;  %v521_v17 = vpop.f32.mrb[7].mxu0  ;;  %v492_v13 = vadd.f32 %v2378_v2, %v315_v8 }
 0x140   : > { %1942 = vpow2.f32 %v1527_v14  ;;  %v522_v18 = vadd.f32 %v521_v17, %v345_v6  ;;  %v330_v17 = vpop.permute.xlu1 %329 }
 0x141   : > { %v1530_v19 = vmul.f32 -1.442695, %v527_v16 }
 0x142   : > { %v1529_v20 = vmul.f32 -1.442695, %v522_v18 }
 0x143   : > { %1944 = vpow2.f32 %v1530_v19 }
 0x144   : > { %1946 = vpow2.f32 %v1529_v20  ;;  %v325_v20 = vpop.permute.xlu0 %324 }
 0x149   : > { %v1941_v21 = vpop.eup %1940 }
 0x14a   : > { %v1943_v22 = vpop.eup %1942  ;;  %v543_v23 = vadd.f32 1.0, %v1941_v21  ;;  %v507_v21 = vadd.f32 %v2380_v4, %v330_v17  ;;  %v1540_v4 = vld [vmem:[%s2550_s3 + $0x28] sm:$0xff] }
 0x14b   : > { %v542_v24 = vadd.f32 1.0, %v1943_v22 }
 0x14c   : > { %1948 = vrcp.f32 %v543_v23  ;;  %v502_v23 = vadd.f32 %v2382_v5, %v325_v20  ;;  %v1541_v5 = vld [vmem:[%s2550_s3 + $0x30] sm:$0xff] }
 0x14d   : > { %v1945_v25 = vpop.eup %1944  ;;  %1950 = vrcp.f32 %v542_v24 }
 0x14e   : > { %v1947_v26 = vpop.eup %1946  ;;  %v545_v27 = vadd.f32 1.0, %v1945_v25 }
 0x14f   : > { %v544_v28 = vadd.f32 1.0, %v1947_v26 }
 0x150   : > { %1952 = vrcp.f32 %v545_v27  ;;  %v1542_v27 = vld [vmem:[%s2550_s3 + $0x38] sm:$0xff] }
 0x151   : > { %1954 = vrcp.f32 %v544_v28  ;;  %v1555_v28 = vld [vmem:[%s2550_s3 + $0x40] sm:$0xff] }
 0x156   : > { %v1949_v29 = vpop.eup %1948 }
 0x157   : > { %v1951_v30 = vpop.eup %1950  ;;  %v555_v31 = vmul.f32 %v1949_v29, %v517_v9  ;;  %v734_v29 = vpop.permute.xlu1 %733 }
 0x158   : > { %v554_v32 = vmul.f32 %v1951_v30, %v512_v11  ;;  %v497_v11 = vadd.f32 %v2376_v1, %v320_v7  ;;  %v729_v30 = vpop.permute.xlu0 %728 }
 0x15a   : > { %v1953_v33 = vpop.eup %1952  ;;  %v1849_v34 = vpack.c.bf16 %v555_v31, %v554_v32 }
 0x15b   : > { %v1955_v35 = vpop.eup %1954  ;;  %v557_v36 = vmul.f32 %v1953_v33, %v527_v16 }
 0x15c   : > { %v556_v37 = vmul.f32 %v1955_v35, %v522_v18  ;;  %1850 = vmatprep.subr.bf16.mxu1 %v1849_v34 }
 0x15d   : > { %1852 = vmatpush3.bf16.msra.mxu1 %v1849_v34 }
 0x15e   : > { %v1853_v38 = vpack.c.bf16 %v557_v36, %v556_v37  ;;  %v744_v36 = vpop.permute.xlu1 %743 }
 0x160   : > { %1854 = vmatprep.subr.bf16.mxu1 %v1853_v38 }
 0x161   : > { %1856 = vmatpush3.bf16.msra.mxu1 %v1853_v38 }
 0x162   : > { %v889_v7 = vpop.permute.xlu1 %888 }
 0x164   : > { %1729 = vmatmul.mubr.msk.f32.vlgmr.msra.gmra.mrb[0].mxu1 %vm586_vm2, %v559_v39  ;;  %v739_v39 = vpop.permute.xlu0 %738 }
 0x165   : > { %1731 = vmatprep.mubr.msk.f32.mxu1 %vm586_vm2, %v560_v40 }
 0x168   : > { %1732 = vmatmul.mubr.msk.f32.gmra.mrb[2].mxu1 %vm586_vm2, %v561_v41  ;;  %v884_v8 = vpop.permute.xlu0 %883 }
 0x169   : > { %1742 = vmatprep.mubr.msk.f32.mxu1 %vm586_vm2, %v1539_v42 }
 0x237   : > { %v1730_v45 = vpop.f32.mrb[0].mxu1 }
 0x238   : > { %v671_v46 = vadd.f32 %v1730_v45, %v574_v43  ;;  %v665_v47 = vpop.f32.mrb[1].mxu1 }
 0x239   : > { %v666_v48 = vadd.f32 %v665_v47, %v569_v44 }
 0x23a   : > { %v1536_v49 = vmul.f32 -1.442695, %v671_v46 }
 0x23b   : > { %v1535_v51 = vmul.f32 -1.442695, %v666_v48  ;;  %v1733_v52 = vpop.f32.mrb[2].mxu1 }
 0x23c   : > { %1956 = vpow2.f32 %v1536_v49  ;;  %v681_v54 = vadd.f32 %v1733_v52, %v584_v50  ;;  %v675_v55 = vpop.f32.mrb[3].mxu1 }
 0x23d   : > { %1958 = vpow2.f32 %v1535_v51  ;;  %v676_v56 = vadd.f32 %v675_v55, %v579_v53 }
 0x23e   : > { %v1538_v57 = vmul.f32 -1.442695, %v681_v54 }
 0x23f   : > { %v1537_v58 = vmul.f32 -1.442695, %v676_v56 }
 0x240   : > { %1960 = vpow2.f32 %v1538_v57 }
 0x241   : > { %1962 = vpow2.f32 %v1537_v58 }
 0x246   : > { %v1957_v59 = vpop.eup %1956 }
 0x247   : > { %v1959_v60 = vpop.eup %1958  ;;  %v697_v61 = vadd.f32 1.0, %v1957_v59 }
 0x248   : > { %v696_v62 = vadd.f32 1.0, %v1959_v60 }
 0x249   : > { %1964 = vrcp.f32 %v697_v61 }
 0x24a   : > { %v1961_v63 = vpop.eup %1960  ;;  %1966 = vrcp.f32 %v696_v62 }
 0x24b   : > { %v1963_v0 = vpop.eup %1962  ;;  %v699_v3 = vadd.f32 1.0, %v1961_v63  ;;  %v1556_v63 = vld [vmem:[%s2550_s3 + $0x48] sm:$0xff] }
 0x24c   : > { %v698_v6 = vadd.f32 1.0, %v1963_v0  ;;  %v1557_v0 = vld [vmem:[%s2550_s3 + $0x50] sm:$0xff] }
 0x24d   : > { %1968 = vrcp.f32 %v699_v3  ;;  %v1558_v3 = vld [vmem:[%s2550_s3 + $0x58] sm:$0xff] }
 0x24e   : > { %1970 = vrcp.f32 %v698_v6  ;;  %v1571_v6 = vld [vmem:[%s2550_s3 + $0x60] sm:$0xff] }
 0x253   : > { %v1965_v9 = vpop.eup %1964 }
 0x254   : > { %v1967_v10 = vpop.eup %1966  ;;  %v709_v12 = vmul.f32 %v1965_v9, %v671_v46 }
 0x255   : > { %v708_v14 = vmul.f32 %v1967_v10, %v666_v48 }
 0x256   : > { %v2402_v15 = vadd.f32 %v709_v12, %v497_v11 }
 0x257   : > { %v1969_v16 = vpop.eup %1968  ;;  %v2404_v18 = vadd.f32 %v708_v14, %v492_v13  ;;  %v899_v14 = vpop.permute.xlu1 %898 }
 0x258   : > { %v1971_v19 = vpop.eup %1970  ;;  %v711_v22 = vmul.f32 %v1969_v16, %v681_v54 }
 0x259   : > { %v710_v24 = vmul.f32 %v1971_v19, %v676_v56  ;;  %v1857_v1 = vpack.c.bf16 %v2402_v15, %v2404_v18  ;;  %v894_v19 = vpop.permute.xlu0 %893 }
 0x25a   : > { %v2410_v25 = vadd.f32 %v711_v22, %v507_v21 }
 0x25b   : > { %v2412_v2 = vadd.f32 %v710_v24, %v502_v23  ;;  %1858 = vmatprep.subr.bf16.mxu1 %v1857_v1 }
 0x25c   : > { %1860 = vmatpush3.bf16.msra.mxu1 %v1857_v1 }
 0x25d   : > { %v1861_v26 = vpack.c.bf16 %v2410_v25, %v2412_v2 }
 0x25f   : > { %1862 = vmatprep.subr.bf16.mxu1 %v1861_v26 }
 0x260   : > { %1864 = vmatpush3.bf16.msra.mxu1 %v1861_v26 }
 0x263   : > { %1743 = vmatmul.mubr.msk.f32.vlgmr.msra.gmra.mrb[4].mxu1 %vm586_vm2, %v1540_v4 }
 0x264   : > { %1745 = vmatprep.mubr.msk.f32.mxu1 %vm586_vm2, %v1541_v5 }
 0x267   : > { %1746 = vmatmul.mubr.msk.f32.gmra.mrb[6].mxu1 %vm586_vm2, %v1542_v27 }
 0x268   : > { %1756 = vmatprep.mubr.msk.f32.mxu1 %vm586_vm2, %v1555_v28 }
 0x336   : > { %v1744_v31 = vpop.f32.mrb[4].mxu1 }
 0x337   : > { %v830_v32 = vadd.f32 %v1744_v31, %v734_v29  ;;  %v824_v33 = vpop.f32.mrb[5].mxu1 }
 0x338   : > { %v825_v34 = vadd.f32 %v824_v33, %v729_v30 }
 0x339   : > { %v1552_v35 = vmul.f32 -1.442695, %v830_v32 }
 0x33a   : > { %v1551_v37 = vmul.f32 -1.442695, %v825_v34  ;;  %v1747_v38 = vpop.f32.mrb[6].mxu1 }
 0x33b   : > { %1972 = vpow2.f32 %v1552_v35  ;;  %v840_v40 = vadd.f32 %v1747_v38, %v744_v36  ;;  %v834_v41 = vpop.f32.mrb[7].mxu1 }
 0x33c   : > { %1974 = vpow2.f32 %v1551_v37  ;;  %v835_v42 = vadd.f32 %v834_v41, %v739_v39 }
 0x33d   : > { %v1554_v43 = vmul.f32 -1.442695, %v840_v40 }
 0x33e   : > { %v1553_v44 = vmul.f32 -1.442695, %v835_v42 }
 0x33f   : > { %1976 = vpow2.f32 %v1554_v43 }
 0x340   : > { %1978 = vpow2.f32 %v1553_v44  ;;  %v1573_v44 = vld [vmem:[%s2550_s3 + $0x70] sm:$0xff] }
 0x345   : > { %v1973_v45 = vpop.eup %1972 }
 0x346   : > { %v1975_v46 = vpop.eup %1974  ;;  %v856_v47 = vadd.f32 1.0, %v1973_v45  ;;  %v1048_v45 = vpop.permute.xlu1 %1047 }
 0x347   : > { %v855_v48 = vadd.f32 1.0, %v1975_v46  ;;  %v1043_v46 = vpop.permute.xlu0 %1042 }
 0x348   : > { %1980 = vrcp.f32 %v856_v47 }
 0x349   : > { %v1977_v49 = vpop.eup %1976  ;;  %1982 = vrcp.f32 %v855_v48 }
 0x34a   : > { %v1979_v50 = vpop.eup %1978  ;;  %v858_v51 = vadd.f32 1.0, %v1977_v49 }
 0x34b   : > { %v857_v52 = vadd.f32 1.0, %v1979_v50 }
 0x34c   : > { %1984 = vrcp.f32 %v858_v51 }
 0x34d   : > { %1986 = vrcp.f32 %v857_v52  ;;  %v1058_v52 = vpop.permute.xlu1 %1057 }
 0x352   : > { %v1981_v53 = vpop.eup %1980 }
 0x353   : > { %v1983_v54 = vpop.eup %1982  ;;  %v868_v55 = vmul.f32 %v1981_v53, %v830_v32 }
 0x354   : > { %v867_v56 = vmul.f32 %v1983_v54, %v825_v34 }
 0x356   : > { %v1985_v57 = vpop.eup %1984  ;;  %v1865_v58 = vpack.c.bf16 %v868_v55, %v867_v56  ;;  %v1053_v55 = vpop.permute.xlu0 %1052 }
 0x357   : > { %v1987_v59 = vpop.eup %1986  ;;  %v870_v60 = vmul.f32 %v1985_v57, %v840_v40 }
 0x358   : > { %v869_v61 = vmul.f32 %v1987_v59, %v835_v42  ;;  %1866 = vmatprep.subr.bf16.mxu1 %v1865_v58 }
 0x359   : > { %1868 = vmatpush3.bf16.msra.mxu1 %v1865_v58 }
 0x35a   : > { %v1869_v62 = vpack.c.bf16 %v870_v60, %v869_v61 }
 0x35c   : > { %1870 = vmatprep.subr.bf16.mxu1 %v1869_v62 }
 0x35d   : > { %1872 = vmatpush3.bf16.msra.mxu1 %v1869_v62 }
 0x360   : > { %1757 = vmatmul.mubr.msk.f32.vlgmr.msra.gmra.mrb[8].mxu1 %vm586_vm2, %v1556_v63 }
 0x361   : > { %1759 = vmatprep.mubr.msk.f32.mxu1 %vm586_vm2, %v1557_v0 }
 0x364   : > { %1760 = vmatmul.mubr.msk.f32.gmra.mrb[10].mxu1 %vm586_vm2, %v1558_v3 }
 0x365   : > { %1770 = vmatprep.mubr.msk.f32.mxu1 %vm586_vm2, %v1571_v6 }
 0x433   : > { %v1758_v9 = vpop.f32.mrb[8].mxu1 }
 0x434   : > { %v985_v10 = vadd.f32 %v1758_v9, %v889_v7  ;;  %v979_v11 = vpop.f32.mrb[9].mxu1 }
 0x435   : > { %v980_v12 = vadd.f32 %v979_v11, %v884_v8 }
 0x436   : > { %v1568_v13 = vmul.f32 -1.442695, %v985_v10 }
 0x437   : > { %v1567_v16 = vmul.f32 -1.442695, %v980_v12  ;;  %v1761_v17 = vpop.f32.mrb[10].mxu1 }
 0x438   : > { %1988 = vpow2.f32 %v1568_v13  ;;  %v995_v20 = vadd.f32 %v1761_v17, %v899_v14  ;;  %v989_v21 = vpop.f32.mrb[11].mxu1 }
 0x439   : > { %1990 = vpow2.f32 %v1567_v16  ;;  %v990_v22 = vadd.f32 %v989_v21, %v894_v19  ;;  %v1588_v21 = vld [vmem:[%s2550_s3 + $0x88] sm:$0xff] }
 0x43a   : > { %v1570_v23 = vmul.f32 -1.442695, %v995_v20 }
 0x43b   : > { %v1569_v24 = vmul.f32 -1.442695, %v990_v22 }
 0x43c   : > { %1992 = vpow2.f32 %v1570_v23  ;;  %v1590_v23 = vld [vmem:[%s2550_s3 + $0x98] sm:$0xff] }
 0x43d   : > { %1994 = vpow2.f32 %v1569_v24  ;;  %v2101_v24 = vmov 0.0|0.0  }
 0x442   : > { %v1989_v1 = vpop.eup %1988 }
 0x443   : > { %v1991_v26 = vpop.eup %1990  ;;  %v1011_v4 = vadd.f32 1.0, %v1989_v1  ;;  %v2103_v1 = vmov 0.0  }
 0x444   : > { %v1010_v5 = vadd.f32 1.0, %v1991_v26  ;;  %v1203_v26 = vpop.permute.xlu1 %1202 }
 0x445   : > { %1996 = vrcp.f32 %v1011_v4  ;;  %v1198_v4 = vpop.permute.xlu0 %1197 }
 0x446   : > { %v1993_v27 = vpop.eup %1992  ;;  %1998 = vrcp.f32 %v1010_v5 }
 0x447   : > { %v1995_v28 = vpop.eup %1994  ;;  %v1013_v29 = vadd.f32 1.0, %v1993_v27 }
 0x448   : > { %v1012_v30 = vadd.f32 1.0, %v1995_v28 }
 0x449   : > { %2000 = vrcp.f32 %v1013_v29 }
 0x44a   : > { %2002 = vrcp.f32 %v1012_v30 }
 0x44f   : > { %v1997_v31 = vpop.eup %1996 }
 0x450   : > { %v1999_v32 = vpop.eup %1998  ;;  %v1023_v33 = vmul.f32 %v1997_v31, %v985_v10  ;;  %v1213_v31 = vpop.permute.xlu1 %1212 }
 0x451   : > { %v1022_v34 = vmul.f32 %v1999_v32, %v980_v12 }
 0x452   : > { %v2449_v35 = vadd.f32 %v1023_v33, %v2402_v15 }
 0x453   : > { %v2001_v36 = vpop.eup %2000  ;;  %v2452_v37 = vadd.f32 %v1022_v34, %v2404_v18  ;;  %v1572_v18 = vld [vmem:[%s2550_s3 + $0x68] sm:$0xff]  ;;  %v1208_v34 = vpop.permute.xlu0 %1207 }
 0x454   : > { %v2003_v38 = vpop.eup %2002  ;;  %v1025_v39 = vmul.f32 %v2001_v36, %v995_v20 }
 0x455   : > { %v1024_v40 = vmul.f32 %v2003_v38, %v990_v22  ;;  %v1873_v41 = vpack.c.bf16 %v2449_v35, %v2452_v37  ;;  %v1589_v22 = vld [vmem:[%s2550_s3 + $0x90] sm:$0xff] }
 0x456   : > { %v2457_v42 = vadd.f32 %v1025_v39, %v2410_v25  ;;  %v1574_v25 = vld [vmem:[%s2550_s3 + $0x78] sm:$0xff] }
 0x457   : > { %v2460_v43 = vadd.f32 %v1024_v40, %v2412_v2  ;;  %1874 = vmatprep.subr.bf16.mxu1 %v1873_v41  ;;  %v1587_v2 = vld [vmem:[%s2550_s3 + $0x80] sm:$0xff] }
 0x458   : > { %1876 = vmatpush3.bf16.msra.mxu1 %v1873_v41 }
 0x459   : > { %v1877_v15 = vpack.c.bf16 %v2457_v42, %v2460_v43 }
 0x45b   : > { %1878 = vmatprep.subr.bf16.mxu1 %v1877_v15 }
 0x45c   : > { %1880 = vmatpush3.bf16.msra.mxu1 %v1877_v15 }
 0x45f   : > { %1771 = vmatmul.mubr.msk.f32.vlgmr.msra.gmra.mrb[12].mxu1 %vm586_vm2, %v1572_v18 }
 0x460   : > { %1773 = vmatprep.mubr.msk.f32.mxu1 %vm586_vm2, %v1573_v44 }
 0x463   : > { %1774 = vmatmul.mubr.msk.f32.gmra.mrb[14].mxu1 %vm586_vm2, %v1574_v25 }
 0x464   : > { %1784 = vmatprep.mubr.msk.f32.mxu1 %vm586_vm2, %v1587_v2 }
 0x532   : > { %v1772_v47 = vpop.f32.mrb[12].mxu1 }
 0x533   : > { %v1144_v48 = vadd.f32 %v1772_v47, %v1048_v45  ;;  %v1138_v49 = vpop.f32.mrb[13].mxu1 }
 0x534   : > { %v1139_v50 = vadd.f32 %v1138_v49, %v1043_v46 }
 0x535   : > { %v1584_v51 = vmul.f32 -1.442695, %v1144_v48 }
 0x536   : > { %v1583_v53 = vmul.f32 -1.442695, %v1139_v50  ;;  %v1775_v54 = vpop.f32.mrb[14].mxu1 }
 0x537   : > { %2004 = vpow2.f32 %v1584_v51  ;;  %v1154_v56 = vadd.f32 %v1775_v54, %v1058_v52  ;;  %v1148_v57 = vpop.f32.mrb[15].mxu1 }
 0x538   : > { %2006 = vpow2.f32 %v1583_v53  ;;  %v1149_v58 = vadd.f32 %v1148_v57, %v1053_v55 }
 0x539   : > { %v1586_v59 = vmul.f32 -1.442695, %v1154_v56 }
 0x53a   : > { %v1585_v60 = vmul.f32 -1.442695, %v1149_v58 }
 0x53b   : > { %2008 = vpow2.f32 %v1586_v59 }
 0x53c   : > { %2010 = vpow2.f32 %v1585_v60 }
 0x541   : > { %v2005_v61 = vpop.eup %2004 }
 0x542   : > { %v2007_v62 = vpop.eup %2006  ;;  %v1170_v63 = vadd.f32 1.0, %v2005_v61 }
 0x543   : > { %v1169_v0 = vadd.f32 1.0, %v2007_v62 }
 0x544   : > { %2012 = vrcp.f32 %v1170_v63 }
 0x545   : > { %v2009_v3 = vpop.eup %2008  ;;  %2014 = vrcp.f32 %v1169_v0  ;;  %v1349_v0 = vpop.permute.xlu0 %1348 }
 0x546   : > { %v2011_v6 = vpop.eup %2010  ;;  %v1172_v7 = vadd.f32 1.0, %v2009_v3 }
 0x547   : > { %v1171_v8 = vadd.f32 1.0, %v2011_v6 }
 0x548   : > { %2016 = vrcp.f32 %v1172_v7 }
 0x549   : > { %2018 = vrcp.f32 %v1171_v8 }
 0x54e   : > { %v2013_v9 = vpop.eup %2012 }
 0x54f   : > { %v2015_v10 = vpop.eup %2014  ;;  %v1182_v11 = vmul.f32 %v2013_v9, %v1144_v48 }
 0x550   : > { %v1181_v12 = vmul.f32 %v2015_v10, %v1139_v50 }
 0x552   : > { %v2017_v13 = vpop.eup %2016  ;;  %v1881_v14 = vpack.c.bf16 %v1182_v11, %v1181_v12 }
 0x553   : > { %v2019_v16 = vpop.eup %2018  ;;  %v1184_v17 = vmul.f32 %v2017_v13, %v1154_v56 }
 0x554   : > { %v1183_v19 = vmul.f32 %v2019_v16, %v1149_v58  ;;  %1882 = vmatprep.subr.bf16.mxu1 %v1881_v14 }
 0x555   : > { %1884 = vmatpush3.bf16.msra.mxu1 %v1881_v14 }
 0x556   : > { %v1885_v20 = vpack.c.bf16 %v1184_v17, %v1183_v19 }
 0x558   : > { %1886 = vmatprep.subr.bf16.mxu1 %v1885_v20 }
 0x559   : > { %1888 = vmatpush3.bf16.msra.mxu1 %v1885_v20 }
 0x55a   : > { %1889 = vmatprep.subr.bf16.mxu1 %v2101_v24 }
 0x55c   : > { %1785 = vmatmul.mubr.msk.f32.vlgmr.msra.gmra.mrb[16].mxu1 %vm586_vm2, %v1588_v21 }
 0x55d   : > { %1787 = vmatprep.mubr.msk.f32.mxu1 %vm586_vm2, %v1589_v22 }
 0x560   : > { %1788 = vmatmul.mubr.msk.f32.gmra.mrb[18].mxu1 %vm586_vm2, %v1590_v23 }
 0x561   : > { %1798 = vmatprep.mubr.msk.f32.mxu1 %vm2102_vm3, %v2103_v1 }
 0x62f   : > { %v1786_v5 = vpop.f32.mrb[16].mxu1 }
 0x630   : > { %v1299_v27 = vadd.f32 %v1786_v5, %v1203_v26  ;;  %v1293_v28 = vpop.f32.mrb[17].mxu1 }
 0x631   : > { %v1294_v29 = vadd.f32 %v1293_v28, %v1198_v4 }
 0x632   : > { %v1600_v30 = vmul.f32 -1.442695, %v1299_v27 }
 0x633   : > { %v1599_v32 = vmul.f32 -1.442695, %v1294_v29  ;;  %v1789_v33 = vpop.f32.mrb[18].mxu1 }
 0x634   : > { %2020 = vpow2.f32 %v1600_v30  ;;  %v1309_v36 = vadd.f32 %v1789_v33, %v1213_v31  ;;  %v1303_v38 = vpop.f32.mrb[19].mxu1 }
 0x635   : > { %2022 = vpow2.f32 %v1599_v32  ;;  %v1304_v39 = vadd.f32 %v1303_v38, %v1208_v34 }
 0x636   : > { %v1602_v40 = vmul.f32 -1.442695, %v1309_v36 }
 0x637   : > { %v1601_v41 = vmul.f32 -1.442695, %v1304_v39 }
 0x638   : > { %2024 = vpow2.f32 %v1602_v40 }
 0x639   : > { %2026 = vpow2.f32 %v1601_v41 }
 0x63e   : > { %v2021_v15 = vpop.eup %2020 }
 0x63f   : > { %v2023_v18 = vpop.eup %2022  ;;  %v1325_v44 = vadd.f32 1.0, %v2021_v15 }
 0x640   : > { %v1324_v25 = vadd.f32 1.0, %v2023_v18 }
 0x641   : > { %2028 = vrcp.f32 %v1325_v44 }
 0x642   : > { %v2025_v2 = vpop.eup %2024  ;;  %2030 = vrcp.f32 %v1324_v25 }
 0x643   : > { %v2027_v45 = vpop.eup %2026  ;;  %v1327_v46 = vadd.f32 1.0, %v2025_v2 }
 0x644   : > { %v1326_v47 = vadd.f32 1.0, %v2027_v45 }
 0x645   : > { %2032 = vrcp.f32 %v1327_v46 }
 0x646   : > { %2034 = vrcp.f32 %v1326_v47 }
 0x64b   : > { %v2029_v48 = vpop.eup %2028 }
 0x64c   : > { %v2031_v49 = vpop.eup %2030  ;;  %v1337_v50 = vmul.f32 %v2029_v48, %v1299_v27 }
 0x64d   : > { %v1336_v51 = vmul.f32 %v2031_v49, %v1294_v29 }
 0x64e   : > { %v1341_v52 = vadd.f32 %v1337_v50, %v2449_v35  ;;  %v1344_v35 = vld [vmem:[%s2552_s5] sm:$0x1] }
 0x64f   : > { %v2033_v53 = vpop.eup %2032  ;;  %v1340_v54 = vadd.f32 %v1336_v51, %v2452_v37  ;;  %v1351_v37 = vlaneseq }
 0x650   : > { %v2035_v55 = vpop.eup %2034  ;;  %v1339_v56 = vmul.f32 %v2033_v53, %v1309_v36 }
 0x651   : > { %v1890_v57 = vpack.c.bf16 %v1341_v52, %v1340_v54  ;;  %v1338_v58 = vmul.f32 %v2035_v55, %v1304_v39  ;;  %v1352_v62 = vshrl.u32 %v1351_v37, 7 }
 0x652   : > { %v1343_v59 = vadd.f32 %v1339_v56, %v2457_v42 }
 0x653   : > { %v1342_v60 = vadd.f32 %v1338_v58, %v2460_v43  ;;  %1891 = vmatpush3.bf16.msra.mxu1 %v1890_v57  ;;  %v1353_v63 = vsub.s32 0, %v1352_v62 }
 0x654   : > { %1892 = vmatprep.subr.bf16.mxu1 %v2101_v24 }
 0x655   : > { %v1893_v61 = vpack.c.bf16 %v1343_v59, %v1342_v60  ;;  %v1354_v42 = vrot.slane %v1349_v0, %v1353_v63 }
 0x657   : > { %1894 = vmatpush3.bf16.msra.mxu1 %v1893_v61 }
 0x65a   : > { %1799 = vmatmul.mubr.msk.f32.vlgmr.msra.gmra.mrb[20].mxu1 %vm586_vm2, %v1344_v35 }
 0x72d   : > { %v1424_v43 = vpop.f32.mrb[20].mxu1 }
 0x72e   : > { %v1425_v3 = vadd.f32 %v1424_v43, %v1354_v42  ;;  %v1800_v6 = vpop.f32.mrb[21].mxu1 }
 0x730   : > { %1428 = vst [vmem:[%s273_s18] sm:$0x1] %v1425_v3 }
 0x731   : > { %2049 = shalt.err (!%p2046_p3)
}
 0x732   : > { %s2050_s14 = scalar_lea.hbm %s2505_s21, 16  ;;  %s2054_s15 = scalar_lea.hbm %s2554_s7, 48 }
 0x733   : > { %p2051_p4 = scmp.ne.s32.totalorder %s2505_s21, %s2050_s14  ;;  %p2055_p9 = scmp.lt.u32.totalorder %s2505_s21, %s2554_s7 }
 0x734   : > { %p2056_p10 = scmp.lt.u32.totalorder %s2054_s15, %s2050_s14  ;;  %p2058_p12 = scmp.lt.u32.totalorder %s2050_s14, %s2505_s21 }
 0x735   : > { %p2052_p7 = pnand %p2051_p4, %p2183_p5 }
 0x736   : > { %p2057_p11 = por %p2056_p10, %p2055_p9 }
 0x737   : > { %p2053_p8 = pneg %p2052_p7 }
 0x738   : > { %p2059_p13 = por %p2058_p12, %p2057_p11 }
 0x73a   : > { %p2060_p0 = pnand %p2059_p13, %p2053_p8 }
 0x73c   : > { %2063 = shalt.err (!%p2060_p0)
}
 0x73d   : > { %1895 = dma.vmem_to_hbm [thread:$0]  (%p2183_p5), %s2507_s19, 16, %s2505_s21, %s1430_s22  }
 0x73e PF: > { %p1901_p1 = scmp.ge.s32.totalorder %s2098_s29, 2  ;;  %s1454_s18 = sand.u32 1, %s2086_s26  }
 0x73f   : > { %s1455_s20 = scalar_lea.sflag [#allocation4], %s1454_s18 }
 0x740   : > { %p1898_p2 = pnand %p1901_p1, %p2187_p6 }
 0x742   : > { %2081 = dma.done.wait (!%p1898_p2), %s1455_s20, 16  }
 0x743   : > { %2083 = vsyncadd (!%p1898_p2), %s1455_s20, 4294967280  ;;  %p19_p3 = scmp.ge.s32.totalorder %s2171_s8, 5   ;;  %s2559_s26 = smov %s2090_s27 }
 0x744   : > { %s2560_s27 = smov %s2094_s28  ;;  %s2561_s28 = smov %s2181_s11 }
 0x745   : > { %s2562_s29 = smov %s2171_s8  ;;  %21 = sbr.rel (!%p19_p3) target bundleno = 6 (0x6), region = 91 }
 0x74c   :  { %1459 = vsyncpa [#allocation4], 1 }
 0x74d   :  { %1461 = vsyncpa [#allocation4 + $0x1], 1 }

</bundles_post_ra>
